<compile_context>
chip_gen: v7x
topology: tpu7x:2x2x1
jax: 0.10.0
libtpu: 0.0.40
codegen_flags: <defaults>
</compile_context>

<pallas_src>
import functools

import jax
import jax.numpy as jnp
from jax.experimental import pallas as pl
from jax.experimental.pallas import tpu as pltpu


# ------------------------------ kernels ------------------------------------


def _pool_kernel(x_ref, sum_ref):
    # x_ref: (tR, tS) block of the flattened input; sum_ref: (tR, 1) accumulator.
    @pl.when(pl.program_id(1) == 0)
    def _():
        sum_ref[...] = jnp.zeros_like(sum_ref)

    sum_ref[...] += jnp.sum(x_ref[...], axis=-1, keepdims=True)


def _gate_kernel(inv_s, sum_ref, w1t_ref, b1_ref, w2t_ref, b2_ref, g_ref):
    # sum_ref: (B, C) pooled sums.  One batched matmul per FC layer.
    z = sum_ref[...] * inv_s                                        # (B, C) means
    h = jnp.dot(z, w1t_ref[...], preferred_element_type=jnp.float32) + b1_ref[...]
    h = jnp.maximum(h, 0.0)                                         # (B, Cr)
    g = jnp.dot(h, w2t_ref[...], preferred_element_type=jnp.float32) + b2_ref[...]
    g_ref[...] = jax.nn.sigmoid(g).astype(g_ref.dtype)              # (B, C)


def _scale_kernel(x_ref, g_ref, o_ref):
    # x_ref: (tR, tS); g_ref: (tR, 1) gate column, broadcast over the lane axis.
    o_ref[...] = (x_ref[...] * g_ref[...]).astype(o_ref.dtype)


# ------------------------------ wrapper -------------------------------------


def _largest_tile(dim, align, max_tile):
    """Largest multiple of `align` dividing `dim` and <= max_tile (else full dim)."""
    best = None
    t = align
    limit = min(dim, max_tile)
    while t <= limit:
        if dim % t == 0:
            best = t
        t += align
    return best if best is not None else dim


def channel_se_3d(x, w1, b1, w2, b2):
    """x: (B, C, D, H, W) f32.  w1: (Cr, C), b1: (Cr,), w2: (C, Cr), b2: (C,)."""
    B, C, D, H, W = x.shape
    Cr = w1.shape[0]
    S = D * H * W
    R = B * C

    x2 = x.reshape(R, S)  # rows = flattened (batch, channel) pairs, lane-dense S

    # Sublane-dense row tiles (multiple of 8) and lane-dense S tiles capped so
    # each (tR, tS) f32 buffer stays around <= 2 MiB (safe on v7x's 64 MiB VMEM).
    tR = _largest_tile(R, 8, 256)
    max_ts = max(128, (2 * 1024 * 1024) // (tR * 4))
    tS = _largest_tile(S, 128, max_ts)
    grid = (R // tR, S // tS)

    # ---- 1) squeeze: tiled global sum over the spatial axis -> (R, 1) -------
    sums = pl.pallas_call(
        _pool_kernel,
        out_shape=jax.ShapeDtypeStruct((R, 1), jnp.float32),
        grid=grid,
        in_specs=[pl.BlockSpec((tR, tS), lambda r, s: (r, s))],
        out_specs=pl.BlockSpec((tR, 1), lambda r, s: (r, 0)),
        compiler_params=pltpu.CompilerParams(
            dimension_semantics=("parallel", "arbitrary")),
    )(x2)

    # ---- 2) excitation: tiny single-block kernel, batched over B ------------
    gates = pl.pallas_call(
        functools.partial(_gate_kernel, 1.0 / float(S)),
        out_shape=jax.ShapeDtypeStruct((B, C), jnp.float32),
        grid=(1,),
        in_specs=[
            pl.BlockSpec((B, C), lambda i: (0, 0)),    # pooled sums
            pl.BlockSpec((C, Cr), lambda i: (0, 0)),   # fc1 weight (pre-transposed)
            pl.BlockSpec((1, Cr), lambda i: (0, 0)),   # fc1 bias
            pl.BlockSpec((Cr, C), lambda i: (0, 0)),   # fc2 weight (pre-transposed)
            pl.BlockSpec((1, C), lambda i: (0, 0)),    # fc2 bias
        ],
        out_specs=pl.BlockSpec((B, C), lambda i: (0, 0)),
    )(sums.reshape(B, C), w1.T, b1.reshape(1, Cr), w2.T, b2.reshape(1, C))

    # ---- 3) scale: memory-bound rescale, tiled over (rows, S) ---------------
    out = pl.pallas_call(
        _scale_kernel,
        out_shape=jax.ShapeDtypeStruct((R, S), x.dtype),
        grid=grid,
        in_specs=[
            pl.BlockSpec((tR, tS), lambda r, s: (r, s)),
            pl.BlockSpec((tR, 1), lambda r, s: (r, 0)),
        ],
        out_specs=pl.BlockSpec((tR, tS), lambda r, s: (r, s)),
        compiler_params=pltpu.CompilerParams(
            dimension_semantics=("parallel", "parallel")),
    )(x2, gates.reshape(R, 1))

    return out.reshape(B, C, D, H, W)


def channel_se_3d_ref(x, w1, b1, w2, b2):
    """Pure-JAX reference mirroring the PyTorch forward."""
    z = jnp.mean(x, axis=(2, 3, 4))                         # (B, C)
    h = jax.nn.relu(z @ w1.T + b1)                          # (B, Cr)
    s = jax.nn.sigmoid(h @ w2.T + b2)                       # (B, C)
    return x * s[:, :, None, None, None]


if __name__ == "__main__":
    B, C, D, H, W = 2, 4, 16, 16, 16
    reduction_ratio = 2
    Cr = C // reduction_ratio

    key = jax.random.PRNGKey(0)
    kx, k1, k2, k3, k4 = jax.random.split(key, 5)

    x = jax.random.normal(kx, (B, C, D, H, W), dtype=jnp.float32)

    # Deterministic parameter init (PyTorch Linear-style uniform bounds).
    bound1 = 1.0 / (C ** 0.5)
    bound2 = 1.0 / (Cr ** 0.5)
    w1 = jax.random.uniform(k1, (Cr, C), jnp.float32, -bound1, bound1)   # fc1.weight
    b1 = jax.random.uniform(k2, (Cr,), jnp.float32, -bound1, bound1)     # fc1.bias
    w2 = jax.random.uniform(k3, (C, Cr), jnp.float32, -bound2, bound2)   # fc2.weight
    b2 = jax.random.uniform(k4, (C,), jnp.float32, -bound2, bound2)      # fc2.bias

    out = channel_se_3d(x, w1, b1, w2, b2)
    out = jax.block_until_ready(out)

    ref = channel_se_3d_ref(x, w1, b1, w2, b2)
    assert out.shape == (B, C, D, H, W)
    assert jnp.allclose(out, ref, atol=1e-5, rtol=1e-5), "mismatch vs reference"

    print("KERNEL_OK")
</pallas_src>

<mosaic_0001>
module attributes {stable_mosaic.version = 11 : i64} {
  func.func @_pool_kernel(%arg0: i32, %arg1: i32, %arg2: memref<8x4096xf32, #tpu.memory_space<vmem>>, %arg3: memref<8x1xf32, #tpu.memory_space<vmem>>) attributes {dimension_semantics = [#tpu.dimension_semantics<parallel>, #tpu.dimension_semantics<arbitrary>], iteration_bounds = array<i64: 1, 1>, scalar_prefetch = 0 : i64, scratch_operands = 0 : i64, tpu.core_type = #tpu.core_type<tc>, window_params = [{transform_indices = @transform_0, window_bounds = array<i64: 8, 4096>}, {transform_indices = @transform_1, window_bounds = array<i64: 8, 1>}]} {
    %c0_i32 = arith.constant 0 : i32
    %0 = arith.cmpi eq, %arg1, %c0_i32 : i32
    %1 = arith.extui %0 : i1 to i32
    %c0_i32_0 = arith.constant 0 : i32
    %2 = arith.cmpi ne, %1, %c0_i32_0 : i32
    scf.if %2 {
      %cst_6 = arith.constant 0.000000e+00 : f32
      %9 = vector.broadcast %cst_6 : f32 to vector<8x1xf32>
      %c0_7 = arith.constant 0 : index
      %c0_8 = arith.constant 0 : index
      %10 = vector.load %arg3[%c0_7, %c0_8] : memref<8x1xf32, #tpu.memory_space<vmem>>, vector<8x1xf32>
      tpu.vector_store %arg3[%c0_7, %c0_8], %9 {strides = array<i32>} : memref<8x1xf32, #tpu.memory_space<vmem>>, vector<8x1xf32>,
    } else {
    }
    %c0 = arith.constant 0 : index
    %c0_1 = arith.constant 0 : index
    %3 = vector.load %arg3[%c0, %c0_1] : memref<8x1xf32, #tpu.memory_space<vmem>>, vector<8x1xf32>
    %c0_2 = arith.constant 0 : index
    %c0_3 = arith.constant 0 : index
    %4 = vector.load %arg2[%c0_2, %c0_3] : memref<8x4096xf32, #tpu.memory_space<vmem>>, vector<8x4096xf32>
    %cst = arith.constant dense<0.000000e+00> : vector<8xf32>
    %5 = vector.multi_reduction <add>, %4, %cst [1] : vector<8x4096xf32> to vector<8xf32>
    %6 = vector.shape_cast %5 : vector<8xf32> to vector<8x1xf32>
    %7 = arith.addf %3, %6 : vector<8x1xf32>
    %c0_4 = arith.constant 0 : index
    %c0_5 = arith.constant 0 : index
    %8 = vector.load %arg3[%c0_4, %c0_5] : memref<8x1xf32, #tpu.memory_space<vmem>>, vector<8x1xf32>
    tpu.vector_store %arg3[%c0_4, %c0_5], %7 {strides = array<i32>} : memref<8x1xf32, #tpu.memory_space<vmem>>, vector<8x1xf32>,
    return
  }
  func.func @transform_0(%arg0: i32, %arg1: i32) -> (i32, i32) {
    %c0_i32 = arith.constant 0 : i32
    return %arg0, %arg1 : i32, i32
  }
  func.func @transform_1(%arg0: i32, %arg1: i32) -> (i32, i32) {
    %c0_i32 = arith.constant 0 : i32
    %c0_i32_0 = arith.constant 0 : i32
    return %arg0, %c0_i32 : i32, i32
  }
}

</mosaic_0001>

<bundles_post_ra>
// kernel: tpu_custom_call.1
= control target key start
LH: loop header
LB: loop body
LE: loop exit
PB: predicated region body
PF: predicated region fallthrough
CT: control target
= control target key end

     0   :  { %6 = vsyncpa [#allocation3], 0  ;;  %s126_s6 = smov [#allocation2]   ;;  %s161_s0 = inlined_call_operand.hbm [shape: f32[8,4096], index: 0, kind: input, shape index: {}]   ;;  %s162_s1 = inlined_call_operand.vmem [shape: f32[8,1], index: 1, kind: output, shape index: {}]  }
   0x1   :  { %s13_s7 = sshll.u32 %s126_s6, 4  ;;  %s102_s10 = scalar_lea.hbm %s161_s0, 4096  ;;  %s14_s7 = int_to_ptr.vmem [resolvable:$true] %s13_s7 }
   0x2   :  { %p103_p0 = scmp.ne.s32.totalorder %s161_s0, %s102_s10  ;;  %p106_p1 = scmp.lt.u32.totalorder %s102_s10, %s161_s0 }
   0x4   :  { %p108_p2 = pnand %p106_p1, %p103_p0 }
   0x6   :  { %111 = shalt.err (!%p108_p2)
}
   0x7   :  { %s112_s15 = scalar_lea.vmem %s14_s7, 4096  ;;  %p117_p4 = scmp.lt.s32.totalorder %s14_s7, %s14_s7 }
   0x8   :  { %p113_p3 = scmp.ne.s32.totalorder %s14_s7, %s112_s15  ;;  %p118_p5 = scmp.lt.s32.totalorder %s112_s15, %s112_s15 }
   0xa   :  { %p119_p6 = por %p118_p5, %p117_p4 }
   0xc   :  { %p120_p7 = pnand %p119_p6, %p113_p3 }
   0xe   :  { %123 = shalt.err (!%p120_p7)
}
   0xf   :  { %16 = dma.hbm_to_vmem [thread:$0]  %s161_s0, 4096, %s14_s7, [#allocation3]  }
  0x10   :  { %124 = dma.done.wait [#allocation3], 4096  }
  0x11   :  { %125 = vsyncadd [#allocation3], 4294963200  ;;  %vm24_vm0 = vcmask 7168   ;;  %v127_v0 = vmov 0.0   ;;  %v27_v1 = vld [vmem:[#allocation2] sm:$0xff]  ;;  %v28_v2 = vld [vmem:[#allocation2 + $0x8] sm:$0xff] }
  0x12   :  { %25 = vst.msk [vmem:[%s162_s1] sm:$0xff] %vm24_vm0, %v127_v0  ;;  %v29_v3 = vld [vmem:[#allocation2 + $0x10] sm:$0xff]  ;;  %v59_v4 = vadd.f32 %v28_v2, %v27_v1  ;;  %v30_v5 = vld [vmem:[#allocation2 + $0x18] sm:$0xff]  ;;  %v31_v7 = vld [vmem:[#allocation2 + $0x20] sm:$0xff] }
  0x13   :  { %v32_v9 = vld [vmem:[#allocation2 + $0x28] sm:$0xff]  ;;  %v33_v11 = vld [vmem:[#allocation2 + $0x30] sm:$0xff]  ;;  %v34_v13 = vld [vmem:[#allocation2 + $0x38] sm:$0xff] }
  0x14   :  { %v60_v6 = vadd.f32 %v59_v4, %v29_v3  ;;  %v35_v15 = vld [vmem:[#allocation2 + $0x40] sm:$0xff]  ;;  %v36_v17 = vld [vmem:[#allocation2 + $0x48] sm:$0xff]  ;;  %v37_v19 = vld [vmem:[#allocation2 + $0x50] sm:$0xff] }
  0x15   :  { %v38_v21 = vld [vmem:[#allocation2 + $0x58] sm:$0xff]  ;;  %v39_v23 = vld [vmem:[#allocation2 + $0x60] sm:$0xff]  ;;  %v40_v25 = vld [vmem:[#allocation2 + $0x68] sm:$0xff] }
  0x16   :  { %v61_v8 = vadd.f32 %v60_v6, %v30_v5  ;;  %v41_v27 = vld [vmem:[#allocation2 + $0x70] sm:$0xff]  ;;  %v42_v29 = vld [vmem:[#allocation2 + $0x78] sm:$0xff]  ;;  %v43_v31 = vld [vmem:[#allocation2 + $0x80] sm:$0xff] }
  0x17   :  { %v44_v33 = vld [vmem:[#allocation2 + $0x88] sm:$0xff]  ;;  %v45_v35 = vld [vmem:[#allocation2 + $0x90] sm:$0xff]  ;;  %v46_v37 = vld [vmem:[#allocation2 + $0x98] sm:$0xff] }
  0x18   :  { %v62_v10 = vadd.f32 %v61_v8, %v31_v7  ;;  %v47_v39 = vld [vmem:[#allocation2 + $0xa0] sm:$0xff]  ;;  %v48_v41 = vld [vmem:[#allocation2 + $0xa8] sm:$0xff]  ;;  %v49_v43 = vld [vmem:[#allocation2 + $0xb0] sm:$0xff] }
  0x19   :  { %v50_v45 = vld [vmem:[#allocation2 + $0xb8] sm:$0xff]  ;;  %v51_v47 = vld [vmem:[#allocation2 + $0xc0] sm:$0xff]  ;;  %v52_v49 = vld [vmem:[#allocation2 + $0xc8] sm:$0xff] }
  0x1a   :  { %v63_v12 = vadd.f32 %v62_v10, %v32_v9  ;;  %v53_v51 = vld [vmem:[#allocation2 + $0xd0] sm:$0xff]  ;;  %v54_v53 = vld [vmem:[#allocation2 + $0xd8] sm:$0xff]  ;;  %v55_v55 = vld [vmem:[#allocation2 + $0xe0] sm:$0xff] }
  0x1b   :  { %v56_v57 = vld [vmem:[#allocation2 + $0xe8] sm:$0xff]  ;;  %v57_v59 = vld [vmem:[#allocation2 + $0xf0] sm:$0xff]  ;;  %v58_v61 = vld [vmem:[#allocation2 + $0xf8] sm:$0xff] }
  0x1c   :  { %v64_v14 = vadd.f32 %v63_v12, %v33_v11  ;;  %v26_v0 = vld [vmem:[%s162_s1] sm:$0xff] }
  0x1e   :  { %v65_v16 = vadd.f32 %v64_v14, %v34_v13 }
  0x20   :  { %v66_v18 = vadd.f32 %v65_v16, %v35_v15 }
  0x22   :  { %v67_v20 = vadd.f32 %v66_v18, %v36_v17 }
  0x24   :  { %v68_v22 = vadd.f32 %v67_v20, %v37_v19 }
  0x26   :  { %v69_v24 = vadd.f32 %v68_v22, %v38_v21 }
  0x28   :  { %v70_v26 = vadd.f32 %v69_v24, %v39_v23 }
  0x2a   :  { %v71_v28 = vadd.f32 %v70_v26, %v40_v25 }
  0x2c   :  { %v72_v30 = vadd.f32 %v71_v28, %v41_v27 }
  0x2e   :  { %v73_v32 = vadd.f32 %v72_v30, %v42_v29 }
  0x30   :  { %v74_v34 = vadd.f32 %v73_v32, %v43_v31 }
  0x32   :  { %v75_v36 = vadd.f32 %v74_v34, %v44_v33 }
  0x34   :  { %v76_v38 = vadd.f32 %v75_v36, %v45_v35 }
  0x36   :  { %v77_v40 = vadd.f32 %v76_v38, %v46_v37 }
  0x38   :  { %v78_v42 = vadd.f32 %v77_v40, %v47_v39 }
  0x3a   :  { %v79_v44 = vadd.f32 %v78_v42, %v48_v41 }
  0x3c   :  { %v80_v46 = vadd.f32 %v79_v44, %v49_v43 }
  0x3e   :  { %v81_v48 = vadd.f32 %v80_v46, %v50_v45 }
  0x40   :  { %v82_v50 = vadd.f32 %v81_v48, %v51_v47 }
  0x42   :  { %v83_v52 = vadd.f32 %v82_v50, %v52_v49 }
  0x44   :  { %v84_v54 = vadd.f32 %v83_v52, %v53_v51 }
  0x46   :  { %v85_v56 = vadd.f32 %v84_v54, %v54_v53 }
  0x48   :  { %v86_v58 = vadd.f32 %v85_v56, %v55_v55 }
  0x4a   :  { %v87_v60 = vadd.f32 %v86_v58, %v56_v57 }
  0x4c   :  { %v88_v62 = vadd.f32 %v87_v60, %v57_v59 }
  0x4e   :  { %v89_v63 = vadd.f32 %v88_v62, %v58_v61 }
  0x50   :  { %90 = vadd.xlane.f32.xlu0 %v89_v63 }
  0xdd   :  { %v91_v1 = vpop.xlane.xlu0 %90 }
  0xde   :  { %v92_v2 = vadd.f32 %v91_v1, %v26_v0 }
  0xe0   :  { %94 = vst.msk [vmem:[%s162_s1] sm:$0xff] %vm24_vm0, %v92_v2 }
  0xe1   :  { %99 = vsyncpa [#allocation3], 1 }

</bundles_post_ra>
